<compile_context>
chip_gen: v5e
topology: v5e:2x2
jax: 0.10.0
libtpu: 0.0.40
codegen_flags: <defaults>
</compile_context>

<pallas_src>
import functools

import jax
import jax.numpy as jnp
from jax.experimental import pallas as pl
from jax.experimental.pallas import tpu as pltpu

LANE = 128


def _round_up(x, m):
    return (x + m - 1) // m * m


# Static output activations (identity is the usual choice for a value net).
# TODO(synk): arbitrary `output_act` callables from the PyTorch ctor must be
# mapped to one of these named, trace-time-static elementwise activations.
_OUTPUT_ACTS = {
    "identity": lambda y: y,
    "relu": lambda y: jnp.maximum(y, 0.0),
    "tanh": jnp.tanh,
    "sigmoid": jax.nn.sigmoid,
}


def mean_value_kernel(state_ref, action_ref,
                      w1_ref, b1_ref, w0_ref, b0_ref,
                      w2s_ref, w2a_ref, b2_ref,
                      w3_ref, b3_ref, out_ref, *, output_act):
    cdt = w1_ref.dtype                      # compute dtype of the matmul operands

    # In-register cast of the f32 activations (free VPU work under the DMA bound).
    s = state_ref[...].astype(cdt)
    a = action_ref[...].astype(cdt)

    # First layer: fc1(state) and fc0(action), f32 accumulation + f32 epilogue.
    h_s = jnp.dot(s, w1_ref[...], preferred_element_type=jnp.float32)
    h_s = jnp.maximum(h_s + b1_ref[...], 0.0)
    h_a = jnp.dot(a, w0_ref[...], preferred_element_type=jnp.float32)
    h_a = jnp.maximum(h_a + b0_ref[...], 0.0)

    # fc2 over the concatenated hidden vector, expressed as split-K
    # (no concat needed; matches torch.cat((state_dense, action_dense), 1)).
    h2 = (jnp.dot(h_s.astype(cdt), w2s_ref[...], preferred_element_type=jnp.float32)
          + jnp.dot(h_a.astype(cdt), w2a_ref[...], preferred_element_type=jnp.float32)
          + b2_ref[...])
    h2 = jnp.maximum(h2, 0.0)

    # fc3 + output activation; narrow (out_size-wide) store, f32.
    y = jnp.dot(h2.astype(cdt), w3_ref[...], preferred_element_type=jnp.float32)
    y = y + b3_ref[...]
    out_ref[...] = _OUTPUT_ACTS[output_act](y).astype(out_ref.dtype)


def prepare_params(params, *, compute_dtype=jnp.bfloat16):
    """One-time weight prep (lane padding, split of fc2, casts). Do NOT call per step."""
    w0, b0, w1, b1, w2, b2, w3, b3 = params
    action_dim, a_hidden = w0.shape          # a_hidden == 64 in the PyTorch module
    state_dim, mid_dim = w1.shape
    out_size = w3.shape[1]

    mid_pad = _round_up(mid_dim, LANE)
    a_pad = _round_up(a_hidden, LANE)

    def pad2(x, r, c):
        return jnp.zeros((r, c), jnp.float32).at[:x.shape[0], :x.shape[1]].set(x)

    w1p = pad2(w1, state_dim, mid_pad).astype(compute_dtype)          # fc1
    b1p = pad2(b1.reshape(1, -1), 1, mid_pad)                         # f32 epilogue
    w0p = pad2(w0, action_dim, a_pad).astype(compute_dtype)           # fc0
    b0p = pad2(b0.reshape(1, -1), 1, a_pad)
    w2s = pad2(w2[:mid_dim, :], mid_pad, mid_pad).astype(compute_dtype)   # fc2, state block
    w2a = pad2(w2[mid_dim:, :], a_pad, mid_pad).astype(compute_dtype)     # fc2, action block
    b2p = pad2(b2.reshape(1, -1), 1, mid_pad)
    w3p = pad2(w3, mid_pad, out_size).astype(compute_dtype)           # fc3 (narrow output)
    b3p = b3.reshape(1, -1).astype(jnp.float32)

    meta = dict(state_dim=state_dim, action_dim=action_dim, out_size=out_size)
    return (w1p, b1p, w0p, b0p, w2s, w2a, b2p, w3p, b3p), meta


def mean_value_net_forward(state, action, prepared, *, output_act="identity",
                           tile_b=2048):
    """state: (B, state_dim), action: (B, action_dim). Returns (B, out_size) f32."""
    (w1p, b1p, w0p, b0p, w2s, w2a, b2p, w3p, b3p), meta = prepared
    B, state_dim = state.shape
    action_dim = action.shape[1]
    assert state_dim == meta["state_dim"] and action_dim == meta["action_dim"]
    mid_pad = w1p.shape[1]
    a_pad = w0p.shape[1]
    out_size = meta["out_size"]

    # --- batch tiling ------------------------------------------------------
    b_ceil = _round_up(B, 16)                 # 16-row granularity (bf16 packing)
    tile_b = min(tile_b, b_ceil)
    # Keep >= 2 grid steps for large batches so the "parallel" batch axis can
    # feed both TensorCores on v7x megacore (no-op on single-TC v5e/v6e).
    if b_ceil >= 2048:
        tile_b = min(tile_b, _round_up(pl.cdiv(b_ceil, 2), 16))
    tile_b = max(16, _round_up(tile_b, 16))
    b_pad = _round_up(B, tile_b)
    if b_pad != B:
        state = jnp.pad(state, ((0, b_pad - B), (0, 0)))
        action = jnp.pad(action, ((0, b_pad - B), (0, 0)))
    grid = (b_pad // tile_b,)

    const = lambda i: (0, 0)
    batched = lambda i: (i, 0)
    kernel = functools.partial(mean_value_kernel, output_act=output_act)

    out = pl.pallas_call(
        kernel,
        out_shape=jax.ShapeDtypeStruct((b_pad, out_size), jnp.float32),
        grid=grid,
        in_specs=[
            pl.BlockSpec((tile_b, state_dim), batched),    # state (f32, batch-tiled)
            pl.BlockSpec((tile_b, action_dim), batched),   # action (f32, batch-tiled)
            pl.BlockSpec((state_dim, mid_pad), const),     # W1 (fc1)
            pl.BlockSpec((1, mid_pad), const),             # b1
            pl.BlockSpec((action_dim, a_pad), const),      # W0 (fc0)
            pl.BlockSpec((1, a_pad), const),               # b0
            pl.BlockSpec((mid_pad, mid_pad), const),       # W2 state-block
            pl.BlockSpec((a_pad, mid_pad), const),         # W2 action-block
            pl.BlockSpec((1, mid_pad), const),             # b2
            pl.BlockSpec((mid_pad, out_size), const),      # W3 (narrow)
            pl.BlockSpec((1, out_size), const),            # b3
        ],
        out_specs=pl.BlockSpec((tile_b, out_size), batched),
        compiler_params=pltpu.CompilerParams(
            dimension_semantics=("parallel",),
            vmem_limit_bytes=64 * 1024 * 1024),
    )(state, action, w1p, b1p, w0p, b0p, w2s, w2a, b2p, w3p, b3p)

    return out[:B, :]


def init_params(key, state_dim, action_dim, mid_dim, output_size=1):
    """nn.Linear-like params. Weights stored as (in_features, out_features)."""
    ks = jax.random.split(key, 8)

    def lin(kw, kb, fan_in, fan_out):
        bound = 1.0 / jnp.sqrt(fan_in)
        w = jax.random.uniform(kw, (fan_in, fan_out), jnp.float32, -bound, bound)
        b = jax.random.uniform(kb, (fan_out,), jnp.float32, -bound, bound)
        return w, b

    a_hidden = 64                                            # hardcoded in module
    w0, b0 = lin(ks[0], ks[1], action_dim, a_hidden)         # fc0: action -> 64
    w1, b1 = lin(ks[2], ks[3], state_dim, mid_dim)           # fc1: state  -> mid
    w2, b2 = lin(ks[4], ks[5], mid_dim + a_hidden, mid_dim)  # fc2
    w3, b3 = lin(ks[6], ks[7], mid_dim, output_size)         # fc3
    return (w0, b0, w1, b1, w2, b2, w3, b3)


def reference_forward(state, action, params, output_act="identity"):
    w0, b0, w1, b1, w2, b2, w3, b3 = params
    action_dense = jax.nn.relu(action @ w0 + b0)
    state_dense = jax.nn.relu(state @ w1 + b1)
    out = jnp.concatenate((state_dense, action_dense), axis=1)
    out = jax.nn.relu(out @ w2 + b2)
    out = out @ w3 + b3
    return _OUTPUT_ACTS[output_act](out)


if __name__ == "__main__":
    batch = 8
    state_dim = 32
    action_dim = 16
    mid_dim = 32
    output_size = 1

    key = jax.random.PRNGKey(0)
    k_state, k_action, k_params = jax.random.split(key, 3)

    state = jax.random.normal(k_state, (batch, state_dim), jnp.float32)
    action = jax.random.normal(k_action, (batch, action_dim), jnp.float32)
    params = init_params(k_params, state_dim, action_dim, mid_dim, output_size)

    # Weight prep is hoisted: do it once, reuse for every forward call.
    prepared = prepare_params(params, compute_dtype=jnp.bfloat16)

    out = mean_value_net_forward(state, action, prepared, output_act="identity")
    out = jax.block_until_ready(out)

    ref = reference_forward(state, action, params, output_act="identity")
    assert out.shape == (batch, output_size), out.shape
    # bf16 matmul operands with f32 accumulation/epilogue -> relaxed tolerance.
    assert jnp.allclose(out, ref, atol=5e-2, rtol=5e-2), \
        float(jnp.max(jnp.abs(out - ref)))

    print("KERNEL_OK")
</pallas_src>

<mosaic_0001>
module attributes {stable_mosaic.version = 11 : i64} {
  func.func @mean_value_kernel(%arg0: i32, %arg1: memref<16x32xf32, #tpu.memory_space<vmem>>, %arg2: memref<16x16xf32, #tpu.memory_space<vmem>>, %arg3: memref<32x128xbf16, #tpu.memory_space<vmem>>, %arg4: memref<1x128xf32, #tpu.memory_space<vmem>>, %arg5: memref<16x128xbf16, #tpu.memory_space<vmem>>, %arg6: memref<1x128xf32, #tpu.memory_space<vmem>>, %arg7: memref<128x128xbf16, #tpu.memory_space<vmem>>, %arg8: memref<128x128xbf16, #tpu.memory_space<vmem>>, %arg9: memref<1x128xf32, #tpu.memory_space<vmem>>, %arg10: memref<128x1xbf16, #tpu.memory_space<vmem>>, %arg11: memref<1x1xf32, #tpu.memory_space<vmem>>, %arg12: memref<16x1xf32, #tpu.memory_space<vmem>>) attributes {dimension_semantics = [#tpu.dimension_semantics<parallel>], iteration_bounds = array<i64: 1>, scalar_prefetch = 0 : i64, scratch_operands = 0 : i64, tpu.core_type = #tpu.core_type<tc>, window_params = [{transform_indices = @transform_0, window_bounds = array<i64: 16, 32>}, {transform_indices = @transform_1, window_bounds = array<i64: 16, 16>}, {pipeline_mode = #tpu.pipeline_mode<synchronous>, transform_indices = @transform_2, window_bounds = array<i64: 32, 128>}, {pipeline_mode = #tpu.pipeline_mode<synchronous>, transform_indices = @transform_3, window_bounds = array<i64: 1, 128>}, {pipeline_mode = #tpu.pipeline_mode<synchronous>, transform_indices = @transform_4, window_bounds = array<i64: 16, 128>}, {pipeline_mode = #tpu.pipeline_mode<synchronous>, transform_indices = @transform_5, window_bounds = array<i64: 1, 128>}, {pipeline_mode = #tpu.pipeline_mode<synchronous>, transform_indices = @transform_6, window_bounds = array<i64: 128, 128>}, {pipeline_mode = #tpu.pipeline_mode<synchronous>, transform_indices = @transform_7, window_bounds = array<i64: 128, 128>}, {pipeline_mode = #tpu.pipeline_mode<synchronous>, transform_indices = @transform_8, window_bounds = array<i64: 1, 128>}, {pipeline_mode = #tpu.pipeline_mode<synchronous>, transform_indices = @transform_9, window_bounds = array<i64: 128, 1>}, {pipeline_mode = #tpu.pipeline_mode<synchronous>, transform_indices = @transform_10, window_bounds = array<i64: 1, 1>}, {transform_indices = @transform_11, window_bounds = array<i64: 16, 1>}]} {
    %c0 = arith.constant 0 : index
    %c0_0 = arith.constant 0 : index
    %0 = vector.load %arg1[%c0, %c0_0] : memref<16x32xf32, #tpu.memory_space<vmem>>, vector<16x32xf32>
    %1 = arith.truncf %0 : vector<16x32xf32> to vector<16x32xbf16>
    %c0_1 = arith.constant 0 : index
    %c0_2 = arith.constant 0 : index
    %2 = vector.load %arg2[%c0_1, %c0_2] : memref<16x16xf32, #tpu.memory_space<vmem>>, vector<16x16xf32>
    %3 = arith.truncf %2 : vector<16x16xf32> to vector<16x16xbf16>
    %c0_3 = arith.constant 0 : index
    %c0_4 = arith.constant 0 : index
    %4 = vector.load %arg3[%c0_3, %c0_4] : memref<32x128xbf16, #tpu.memory_space<vmem>>, vector<32x128xbf16>
    %cst = arith.constant dense<0.000000e+00> : vector<16x128xf32>
    %5 = tpu.matmul %1, %4, %cst {dimension_numbers = #tpu.dot_dimension_numbers<[1], [0], [0], [1], [0, 0, 1, 1], [], []>} : vector<16x32xbf16>, vector<32x128xbf16>, vector<16x128xf32> -> vector<16x128xf32>
    %c0_5 = arith.constant 0 : index
    %c0_6 = arith.constant 0 : index
    %6 = vector.load %arg4[%c0_5, %c0_6] : memref<1x128xf32, #tpu.memory_space<vmem>>, vector<1x128xf32>
    %7 = vector.broadcast %6 : vector<1x128xf32> to vector<16x128xf32>
    %8 = arith.addf %5, %7 : vector<16x128xf32>
    %cst_7 = arith.constant 0.000000e+00 : f32
    %9 = vector.broadcast %cst_7 : f32 to vector<16x128xf32>
    %10 = arith.maximumf %8, %9 : vector<16x128xf32>
    %c0_8 = arith.constant 0 : index
    %c0_9 = arith.constant 0 : index
    %11 = vector.load %arg5[%c0_8, %c0_9] : memref<16x128xbf16, #tpu.memory_space<vmem>>, vector<16x128xbf16>
    %cst_10 = arith.constant dense<0.000000e+00> : vector<16x128xf32>
    %12 = tpu.matmul %3, %11, %cst_10 {dimension_numbers = #tpu.dot_dimension_numbers<[1], [0], [0], [1], [0, 0, 1, 1], [], []>} : vector<16x16xbf16>, vector<16x128xbf16>, vector<16x128xf32> -> vector<16x128xf32>
    %c0_11 = arith.constant 0 : index
    %c0_12 = arith.constant 0 : index
    %13 = vector.load %arg6[%c0_11, %c0_12] : memref<1x128xf32, #tpu.memory_space<vmem>>, vector<1x128xf32>
    %14 = vector.broadcast %13 : vector<1x128xf32> to vector<16x128xf32>
    %15 = arith.addf %12, %14 : vector<16x128xf32>
    %cst_13 = arith.constant 0.000000e+00 : f32
    %16 = vector.broadcast %cst_13 : f32 to vector<16x128xf32>
    %17 = arith.maximumf %15, %16 : vector<16x128xf32>
    %18 = arith.truncf %10 : vector<16x128xf32> to vector<16x128xbf16>
    %c0_14 = arith.constant 0 : index
    %c0_15 = arith.constant 0 : index
    %19 = vector.load %arg7[%c0_14, %c0_15] : memref<128x128xbf16, #tpu.memory_space<vmem>>, vector<128x128xbf16>
    %cst_16 = arith.constant dense<0.000000e+00> : vector<16x128xf32>
    %20 = tpu.matmul %18, %19, %cst_16 {dimension_numbers = #tpu.dot_dimension_numbers<[1], [0], [0], [1], [0, 0, 1, 1], [], []>} : vector<16x128xbf16>, vector<128x128xbf16>, vector<16x128xf32> -> vector<16x128xf32>
    %21 = arith.truncf %17 : vector<16x128xf32> to vector<16x128xbf16>
    %c0_17 = arith.constant 0 : index
    %c0_18 = arith.constant 0 : index
    %22 = vector.load %arg8[%c0_17, %c0_18] : memref<128x128xbf16, #tpu.memory_space<vmem>>, vector<128x128xbf16>
    %cst_19 = arith.constant dense<0.000000e+00> : vector<16x128xf32>
    %23 = tpu.matmul %21, %22, %cst_19 {dimension_numbers = #tpu.dot_dimension_numbers<[1], [0], [0], [1], [0, 0, 1, 1], [], []>} : vector<16x128xbf16>, vector<128x128xbf16>, vector<16x128xf32> -> vector<16x128xf32>
    %24 = arith.addf %20, %23 : vector<16x128xf32>
    %c0_20 = arith.constant 0 : index
    %c0_21 = arith.constant 0 : index
    %25 = vector.load %arg9[%c0_20, %c0_21] : memref<1x128xf32, #tpu.memory_space<vmem>>, vector<1x128xf32>
    %26 = vector.broadcast %25 : vector<1x128xf32> to vector<16x128xf32>
    %27 = arith.addf %24, %26 : vector<16x128xf32>
    %cst_22 = arith.constant 0.000000e+00 : f32
    %28 = vector.broadcast %cst_22 : f32 to vector<16x128xf32>
    %29 = arith.maximumf %27, %28 : vector<16x128xf32>
    %30 = arith.truncf %29 : vector<16x128xf32> to vector<16x128xbf16>
    %c0_23 = arith.constant 0 : index
    %c0_24 = arith.constant 0 : index
    %31 = vector.load %arg10[%c0_23, %c0_24] : memref<128x1xbf16, #tpu.memory_space<vmem>>, vector<128x1xbf16>
    %cst_25 = arith.constant dense<0.000000e+00> : vector<16x1xf32>
    %32 = tpu.matmul %30, %31, %cst_25 {dimension_numbers = #tpu.dot_dimension_numbers<[1], [0], [0], [1], [0, 0, 1, 1], [], []>} : vector<16x128xbf16>, vector<128x1xbf16>, vector<16x1xf32> -> vector<16x1xf32>
    %c0_26 = arith.constant 0 : index
    %c0_27 = arith.constant 0 : index
    %33 = vector.load %arg11[%c0_26, %c0_27] : memref<1x1xf32, #tpu.memory_space<vmem>>, vector<1x1xf32>
    %34 = vector.broadcast %33 : vector<1x1xf32> to vector<16x1xf32>
    %35 = arith.addf %32, %34 : vector<16x1xf32>
    %c0_28 = arith.constant 0 : index
    %c0_29 = arith.constant 0 : index
    %36 = vector.load %arg12[%c0_28, %c0_29] : memref<16x1xf32, #tpu.memory_space<vmem>>, vector<16x1xf32>
    tpu.vector_store %arg12[%c0_28, %c0_29], %35 {strides = array<i32>} : memref<16x1xf32, #tpu.memory_space<vmem>>, vector<16x1xf32>,
    return
  }
  func.func @transform_0(%arg0: i32) -> (i32, i32) {
    %c0_i32 = arith.constant 0 : i32
    %c0_i32_0 = arith.constant 0 : i32
    return %arg0, %c0_i32 : i32, i32
  }
  func.func @transform_1(%arg0: i32) -> (i32, i32) {
    %c0_i32 = arith.constant 0 : i32
    %c0_i32_0 = arith.constant 0 : i32
    return %arg0, %c0_i32 : i32, i32
  }
  func.func @transform_2(%arg0: i32) -> (i32, i32) {
    %c0_i32 = arith.constant 0 : i32
    %c0_i32_0 = arith.constant 0 : i32
    %c0_i32_1 = arith.constant 0 : i32
    return %c0_i32, %c0_i32_0 : i32, i32
  }
  func.func @transform_3(%arg0: i32) -> (i32, i32) {
    %c0_i32 = arith.constant 0 : i32
    %c0_i32_0 = arith.constant 0 : i32
    %c0_i32_1 = arith.constant 0 : i32
    return %c0_i32, %c0_i32_0 : i32, i32
  }
  func.func @transform_4(%arg0: i32) -> (i32, i32) {
    %c0_i32 = arith.constant 0 : i32
    %c0_i32_0 = arith.constant 0 : i32
    %c0_i32_1 = arith.constant 0 : i32
    return %c0_i32, %c0_i32_0 : i32, i32
  }
  func.func @transform_5(%arg0: i32) -> (i32, i32) {
    %c0_i32 = arith.constant 0 : i32
    %c0_i32_0 = arith.constant 0 : i32
    %c0_i32_1 = arith.constant 0 : i32
    return %c0_i32, %c0_i32_0 : i32, i32
  }
  func.func @transform_6(%arg0: i32) -> (i32, i32) {
    %c0_i32 = arith.constant 0 : i32
    %c0_i32_0 = arith.constant 0 : i32
    %c0_i32_1 = arith.constant 0 : i32
    return %c0_i32, %c0_i32_0 : i32, i32
  }
  func.func @transform_7(%arg0: i32) -> (i32, i32) {
    %c0_i32 = arith.constant 0 : i32
    %c0_i32_0 = arith.constant 0 : i32
    %c0_i32_1 = arith.constant 0 : i32
    return %c0_i32, %c0_i32_0 : i32, i32
  }
  func.func @transform_8(%arg0: i32) -> (i32, i32) {
    %c0_i32 = arith.constant 0 : i32
    %c0_i32_0 = arith.constant 0 : i32
    %c0_i32_1 = arith.constant 0 : i32
    return %c0_i32, %c0_i32_0 : i32, i32
  }
  func.func @transform_9(%arg0: i32) -> (i32, i32) {
    %c0_i32 = arith.constant 0 : i32
    %c0_i32_0 = arith.constant 0 : i32
    %c0_i32_1 = arith.constant 0 : i32
    return %c0_i32, %c0_i32_0 : i32, i32
  }
  func.func @transform_10(%arg0: i32) -> (i32, i32) {
    %c0_i32 = arith.constant 0 : i32
    %c0_i32_0 = arith.constant 0 : i32
    %c0_i32_1 = arith.constant 0 : i32
    return %c0_i32, %c0_i32_0 : i32, i32
  }
  func.func @transform_11(%arg0: i32) -> (i32, i32) {
    %c0_i32 = arith.constant 0 : i32
    %c0_i32_0 = arith.constant 0 : i32
    return %arg0, %c0_i32 : i32, i32
  }
}

</mosaic_0001>

<bundles_post_ra>
// kernel: tpu_custom_call.1
= control target key start
LH: loop header
LB: loop body
LE: loop exit
PB: predicated region body
PF: predicated region fallthrough
CT: control target
= control target key end

     0   :  { %s882_s0 = inlined_call_operand.hbm [shape: f32[16,32], index: 0, kind: input, shape index: {}]   ;;  %s883_s1 = inlined_call_operand.hbm [shape: f32[16,16], index: 1, kind: input, shape index: {}]   ;;  %s884_s2 = inlined_call_operand.hbm [shape: bf16[32,128], index: 2, kind: input, shape index: {}]   ;;  %s885_s3 = inlined_call_operand.vmem [shape: f32[1,128], index: 3, kind: input, shape index: {}]   ;;  %s886_s4 = inlined_call_operand.hbm [shape: bf16[16,128], index: 4, kind: input, shape index: {}]   ;;  %s887_s5 = inlined_call_operand.vmem [shape: f32[1,128], index: 5, kind: input, shape index: {}]   ;;  %s888_s6 = inlined_call_operand.vmem [shape: bf16[128,128], index: 6, kind: input, shape index: {}]   ;;  %s889_s7 = inlined_call_operand.hbm [shape: bf16[128,128], index: 7, kind: input, shape index: {}]   ;;  %s890_s8 = inlined_call_operand.vmem [shape: f32[1,128], index: 8, kind: input, shape index: {}]   ;;  %s891_s9 = inlined_call_operand.vmem [shape: bf16[128,1], index: 9, kind: input, shape index: {}]   ;;  %s892_s10 = inlined_call_operand.<no memory space> [shape: f32[1,1], index: 10, kind: input, shape index: {}]   ;;  %s893_s11 = inlined_call_operand.vmem [shape: f32[16,1], index: 11, kind: output, shape index: {}]  }
   0x1   :  { %v16_v0 = vstv %s892_s10 }
   0x2   :  { %17 = vst [vmem:[#allocation2] sm:$0x1] %v16_v0 }
   0x3   :  { %18 = vsyncpa [#allocation4], 0 }
   0x4   :  { %19 = vsyncpa [#allocation6], 0 }
   0x5   :  { %20 = vsyncpa [#allocation9], 0  ;;  %s38_s21 = sshll.u32 %s883_s1, 4  ;;  %s732_s22 = smov [#allocation5]   ;;  %s39_s21 = int_to_ptr.hbm [resolvable:$true] %s38_s21 }
   0x6   :  { %s40_s23 = sshll.u32 %s732_s22, 4  ;;  %s733_s24 = smov 128   ;;  %s41_s23 = int_to_ptr.vmem [resolvable:$true] %s40_s23 }
   0x7   :  { %s734_s25 = smov 8   ;;  %s66_s28 = sshll.u32 %s886_s4, 4  ;;  %s67_s28 = int_to_ptr.hbm [resolvable:$true] %s66_s28 }
   0x8   :  { %46 = dma.hbm_to_vmem [thread:$0]  %s39_s21, 256, %s41_s23, [#allocation6], %s733_s24, %s733_s24, %s734_s25  }
   0x9   :  { %s735_s10 = smov [#allocation8]   ;;  %s25_s13 = sshll.u32 %s882_s0, 4  ;;  %s26_s13 = int_to_ptr.hbm [resolvable:$true] %s25_s13 }
   0xa   :  { %s68_s29 = sshll.u32 %s735_s10, 4  ;;  %s736_s1 = smov 64   ;;  %s69_s29 = int_to_ptr.vmem [resolvable:$true] %s68_s29 }
   0xb   :  { %s737_s14 = smov 4   ;;  %s51_s17 = sshll.u32 %s884_s2, 4  ;;  %s52_s17 = int_to_ptr.hbm [resolvable:$true] %s51_s17 }
   0xc   :  { %74 = dma.hbm_to_vmem [thread:$0]  %s67_s28, 128, %s69_s29, [#allocation9], %s736_s1, %s736_s1, %s737_s14  }
   0xd   :  { %s738_s18 = smov [#allocation3]   ;;  %s739_s4 = smov [#allocation7]  }
   0xe   :  { %s27_s19 = sshll.u32 %s738_s18, 4  ;;  %s53_s20 = sshll.u32 %s739_s4, 4  ;;  %s28_s19 = int_to_ptr.vmem [resolvable:$true] %s27_s19  ;;  %s54_s20 = int_to_ptr.vmem [resolvable:$true] %s53_s20 }
   0xf   :  { %33 = dma.hbm_to_vmem [thread:$0]  %s26_s13, 256, %s28_s19, [#allocation4], %s733_s24, %s733_s24, %s734_s25  }
  0x10   :  { %s83_s0 = sshll.u32 %s889_s7, 4  ;;  %s740_s23 = smov [#allocation10]   ;;  %s84_s0 = int_to_ptr.hbm [resolvable:$true] %s83_s0 }
  0x11   :  { %59 = dma.hbm_to_vmem [thread:$0]  %s52_s17, 256, %s54_s20, [#allocation6], %s736_s1, %s736_s1, %s737_s14  }
  0x12   :  { %s85_s26 = sshll.u32 %s740_s23, 4  ;;  %s86_s26 = int_to_ptr.vmem [resolvable:$true] %s85_s26 }
  0x13   :  { %91 = dma.hbm_to_vmem [thread:$0]  %s84_s0, 1024, %s86_s26, [#allocation9], %s736_s1, %s736_s1, %s737_s14  }
  0x14   :  { %726 = dma.done.wait [#allocation4], 256  }
  0x15   :  { %727 = vsyncadd [#allocation4], 4294967040 }
  0x16   :  { %728 = dma.done.wait [#allocation6], 512  }
  0x17   :  { %729 = vsyncadd [#allocation6], 4294966784 }
  0x18   :  { %730 = dma.done.wait [#allocation9], 1152  }
  0x19   :  { %731 = vsyncadd [#allocation9], 4294966144  ;;  %v567_v1 = vld [vmem:[#allocation7 + $0x8] sm:$0xff]  ;;  %v566_v2 = vld [vmem:[#allocation7] sm:$0xff]  ;;  %vm145_vm0 = vcmask 261120   ;;  %vm177_vm1 = vcmask 130048  }
  0x1a   :  { %155 = vmatpush.bf16.msra.mxu0 %v567_v1  ;;  %v119_v3 = vld [vmem:[#allocation3] sm:$0xff]  ;;  %v120_v4 = vld [vmem:[#allocation3 + $0x8] sm:$0xff]  ;;  %v576_v5 = vld [vmem:[%s888_s6 + $0x38] sm:$0xff]  ;;  %vm446_vm2 = vcmask 7168  }
  0x1b   :  { %v568_v6 = vld [vmem:[#allocation8] sm:$0xff]  ;;  %341 = vmatpush.bf16.msra.mxu3 %v576_v5  ;;  %v121_v8 = vpack.c.bf16 %v120_v4, %v119_v3  ;;  %v574_v9 = vld [vmem:[%s888_s6 + $0x28] sm:$0xff]  ;;  %v573_v10 = vld [vmem:[%s888_s6 + $0x20] sm:$0xff] }
  0x1c   :  { %v575_v7 = vld [vmem:[%s888_s6 + $0x30] sm:$0xff]  ;;  %v123_v12 = vld [vmem:[#allocation5 + $0x8] sm:$0xff]  ;;  %v582_v18 = vld [vmem:[#allocation10 + $0x28] sm:$0xff] }
  0x1d   :  { %v122_v11 = vld [vmem:[#allocation5] sm:$0xff]  ;;  %v583_v16 = vld [vmem:[#allocation10 + $0x30] sm:$0xff]  ;;  %v581_v20 = vld [vmem:[#allocation10 + $0x20] sm:$0xff] }
  0x1e   :  { %156 = vmatpush.bf16.msra.mxu0 %v566_v2  ;;  %v124_v13 = vpack.c.bf16 %v123_v12, %v122_v11  ;;  %v584_v14 = vld [vmem:[#allocation10 + $0x38] sm:$0xff]  ;;  %v570_v19 = vld [vmem:[%s888_s6 + $0x8] sm:$0xff]  ;;  %v569_v21 = vld [vmem:[%s888_s6] sm:$0xff] }
  0x1f   :  { %342 = vmatpush.bf16.msra.mxu3 %v575_v7  ;;  %v572_v15 = vld [vmem:[%s888_s6 + $0x18] sm:$0xff]  ;;  %279 = vmatpush.bf16.msra.mxu2 %v584_v14  ;;  %v571_v17 = vld [vmem:[%s888_s6 + $0x10] sm:$0xff]  ;;  %v578_v24 = vld [vmem:[#allocation10 + $0x8] sm:$0xff] }
  0x20   :  { %v580_v22 = vld [vmem:[#allocation10 + $0x18] sm:$0xff]  ;;  %v579_v23 = vld [vmem:[#allocation10 + $0x10] sm:$0xff]  ;;  %v577_v25 = vld [vmem:[#allocation10] sm:$0xff] }
  0x21   :  { %464 = vmatmul.msk.bf16.vlgmr.msra.gmra.mxu0 %vm145_vm0, %v121_v8  ;;  %v602_v27 = vld [vmem:[%s885_s3] ss:$0 sm:$0xff]  ;;  %v592_v42 = vld [vmem:[%s891_s9 + $0x38] sm:$0xff]  ;;  %v591_v43 = vld [vmem:[%s891_s9 + $0x30] sm:$0xff] }
  0x22   :  { %188 = vmatpush.bf16.msrb.mxu0 %v568_v6  ;;  %v603_v35 = vld [vmem:[%s887_s5] ss:$0 sm:$0xff]  ;;  %432 = vmatpush.bf16.msra.mxu1 %v592_v42  ;;  %v590_v44 = vld [vmem:[%s891_s9 + $0x28] sm:$0xff]  ;;  %v588_v46 = vld [vmem:[%s891_s9 + $0x18] sm:$0xff] }
  0x23   :  { %343 = vmatpush.bf16.msra.mxu3 %v574_v9  ;;  %280 = vmatpush.bf16.msra.mxu2 %v583_v16  ;;  %v589_v45 = vld [vmem:[%s891_s9 + $0x20] sm:$0xff]  ;;  %v587_v47 = vld [vmem:[%s891_s9 + $0x10] sm:$0xff]  ;;  %v586_v48 = vld [vmem:[%s891_s9 + $0x8] sm:$0xff] }
  0x24   :  { %v585_v49 = vld [vmem:[%s891_s9] sm:$0xff] }
  0x25   :  { %v604_v53 = vld [vmem:[%s890_s8] ss:$0 sm:$0xff] }
  0x26   :  { %433 = vmatpush.bf16.msra.mxu1 %v591_v43  ;;  %v605_v62 = vld [vmem:[#allocation2] ss:$0 sm:$0xff] }
  0x27   :  { %344 = vmatpush.bf16.msra.mxu3 %v573_v10  ;;  %281 = vmatpush.bf16.msra.mxu2 %v582_v18 }
  0x2a   :  { %434 = vmatpush.bf16.msra.mxu1 %v590_v44 }
  0x2b   :  { %345 = vmatpush.bf16.msra.mxu3 %v572_v15  ;;  %282 = vmatpush.bf16.msra.mxu2 %v581_v20 }
  0x2e   :  { %435 = vmatpush.bf16.msra.mxu1 %v589_v45 }
  0x2f   :  { %346 = vmatpush.bf16.msra.mxu3 %v571_v17  ;;  %283 = vmatpush.bf16.msra.mxu2 %v580_v22 }
  0x31   :  { %469 = vmatmul.msk.bf16.vlgmr.msrb.gmra.mxu0 %vm177_vm1, %v124_v13 }
  0x32   :  { %436 = vmatpush.bf16.msra.mxu1 %v588_v46 }
  0x33   :  { %347 = vmatpush.bf16.msra.mxu3 %v570_v19  ;;  %284 = vmatpush.bf16.msra.mxu2 %v579_v23 }
  0x36   :  { %437 = vmatpush.bf16.msra.mxu1 %v587_v47 }
  0x37   :  { %348 = vmatpush.bf16.msra.mxu3 %v569_v21  ;;  %285 = vmatpush.bf16.msra.mxu2 %v578_v24 }
  0x3a   :  { %438 = vmatpush.bf16.msra.mxu1 %v586_v48 }
  0x3b   :  { %286 = vmatpush.bf16.msra.mxu2 %v577_v25 }
  0x3e   :  { %439 = vmatpush.bf16.msra.mxu1 %v585_v49 }
  0x9e   :  { %v158_v26 = vpop.f32.mrf.mxu0 }
  0x9f   :  { %v159_v28 = vadd.f32 %v602_v27, %v158_v26 }
  0xa1   :  { %v163_v31 = vmax.f32 %v159_v28, 0.0 }
  0xa6   :  { %v160_v29 = vpop.f32.mrf.mxu0 }
  0xa7   :  { %v161_v30 = vadd.f32 %v602_v27, %v160_v29 }
  0xa9   :  { %v164_v32 = vmax.f32 %v161_v30, 0.0 }
  0xab   :  { %v197_v33 = vpack.c.bf16 %v164_v32, %v163_v31 }
  0xad   :  { %349 = vmatmul.bf16.vlgmr.msra.gmra.mxu3 %v197_v33 }
  0xae   :  { %v190_v34 = vpop.f32.mrf.mxu0 }
  0xaf   :  { %v191_v36 = vadd.f32 %v603_v35, %v190_v34 }
  0xb1   :  { %v195_v39 = vmax.f32 %v191_v36, 0.0 }
  0xb6   :  { %v192_v37 = vpop.f32.mrf.mxu0 }
  0xb7   :  { %v193_v38 = vadd.f32 %v603_v35, %v192_v37 }
  0xb9   :  { %v196_v40 = vmax.f32 %v193_v38, 0.0 }
  0xbb   :  { %v214_v41 = vpack.c.bf16 %v196_v40, %v195_v39 }
  0xbd   :  { %287 = vmatmul.bf16.vlgmr.msra.gmra.mxu2 %v214_v41 }
 0x130   :  { %v350_v50 = vpop.f32.mrf.mxu3 }
 0x138   :  { %v352_v54 = vpop.f32.mrf.mxu3 }
 0x140   :  { %v288_v51 = vpop.f32.mrf.mxu2 }
 0x141   :  { %v351_v52 = vadd.f32 %v350_v50, %v288_v51 }
 0x143   :  { %v359_v56 = vadd.f32 %v604_v53, %v351_v52 }
 0x145   :  { %v361_v59 = vmax.f32 %v359_v56, 0.0 }
 0x148   :  { %v290_v55 = vpop.f32.mrf.mxu2 }
 0x149   :  { %v353_v57 = vadd.f32 %v352_v54, %v290_v55 }
 0x14b   :  { %v360_v58 = vadd.f32 %v604_v53, %v353_v57 }
 0x14d   :  { %v362_v60 = vmax.f32 %v360_v58, 0.0 }
 0x14f   :  { %v363_v61 = vpack.c.bf16 %v362_v60, %v361_v59 }
 0x151   :  { %440 = vmatmul.bf16.vlgmr.msra.gmra.mxu1 %v363_v61 }
 0x1ce   :  { %v441_v63 = vpop.f32.mrf.mxu1 }
 0x1cf   :  { %v442_v0 = vadd.f32 %v605_v62, %v441_v63 }
 0x1d1   :  { %447 = vst.msk [vmem:[%s893_s11] sm:$0xff] %vm446_vm2, %v442_v0 }
 0x1d6   :  { %v443_v1 = vpop.f32.mrf.mxu1 }
 0x1d7   :  { %v444_v2 = vadd.f32 %v605_v62, %v443_v1 }
 0x1d9   :  { %448 = vst.msk [vmem:[%s893_s11 + $0x8] sm:$0xff] %vm446_vm2, %v444_v2 }
 0x1da   :  { %453 = vsyncpa [#allocation4], 1 }
 0x1db   :  { %454 = vsyncpa [#allocation6], 1 }
 0x1dc   :  { %455 = vsyncpa [#allocation9], 1 }

</bundles_post_ra>
